<compile_context>
chip_gen: v7x
topology: tpu7x:2x2x1
jax: 0.10.0
libtpu: 0.0.40
codegen_flags: <defaults>
</compile_context>

<pallas_src>
import jax
import jax.numpy as jnp
import numpy as np
from jax import lax
from jax.experimental import pallas as pl
from jax.experimental.pallas import tpu as pltpu

# ----------------------------- configuration -------------------------------
B = 2                # batch
C_IN = 4             # input channels
H = W = 16           # spatial
HW = H * W           # 256 (one batch element's lane span)
NUM_FEATURES = 32    # backbone.num_features (feat_planes)
NUM_CLASSES = 10     # backbone classifier output
NUM_ROT = 4          # rotation classifier output (fixed by the module)
NUM_HEAD = NUM_CLASSES + NUM_ROT
HEAD_PAD = 128       # lane-dense padded width of the fused head output
K = 9 * C_IN         # im2col contraction length (36)
K_PAD = 48           # padded to a multiple of 16 (bf16 sublane tile)


# ------------------------------ Pallas kernel -------------------------------
def remixmatch_kernel(patches_ref, wconv_ref, bconv_ref,
                      wheads_ref, bheads_ref, out_ref):
    """Whole batch in one step: bf16 conv matmul -> ReLU -> GAP -> fused heads.

    patches_ref: (K_PAD, B*HW)           bf16 im2col columns, lane = b*HW + hw
    wconv_ref  : (NUM_FEATURES, K_PAD)   bf16 flattened 3x3 conv weights
    bconv_ref  : (NUM_FEATURES, 1)       f32 conv bias
    wheads_ref : (NUM_FEATURES, HEAD_PAD) f32 [wfc | wrot | 0] / (H*W)
    bheads_ref : (1, HEAD_PAD)           f32 [bfc | brot | 0]
    out_ref    : (B, HEAD_PAD)           f32 [logits | logits_rot | 0] per row
    """
    # 3x3 "same" conv for the whole batch as ONE bf16 MXU matmul, f32 accum:
    # (F, K_PAD) @ (K_PAD, B*HW) -> (F, B*HW).
    conv = jnp.dot(wconv_ref[...], patches_ref[...],
                   preferred_element_type=jnp.float32)
    conv = jnp.maximum(conv + bconv_ref[...], 0.0)           # bias + ReLU (f32)

    # Global average pool: per-batch spatial sums via static, 128-aligned lane
    # slices (XLU lane reduce).  The 1/(H*W) scale is folded into wheads.
    feat = jnp.concatenate(
        [jnp.sum(conv[:, b * HW:(b + 1) * HW], axis=1, keepdims=True)
         for b in range(B)],
        axis=1)                                               # (F, B) f32

    # Fused classifier + rotation heads as one MXU contraction over F
    # (transposed-lhs "TN" dims): feat^T (B,F) @ wheads (F,128) -> (B,128).
    head = lax.dot_general(feat, wheads_ref[...],
                           dimension_numbers=(((0,), (0,)), ((), ())),
                           preferred_element_type=jnp.float32)
    out_ref[...] = head + bheads_ref[...]                     # lane-dense store


# ------------------------------ JAX wrapper ---------------------------------
def init_params(key):
    """Deterministic synthetic parameters (no checkpoint)."""
    k1, k2, k3, k4, k5, k6 = jax.random.split(key, 6)
    return {
        "wconv": jax.random.normal(k1, (3, 3, C_IN, NUM_FEATURES),
                                   jnp.float32) * 0.1,
        "bconv": jax.random.normal(k2, (NUM_FEATURES,), jnp.float32) * 0.01,
        # Linear weights stored as (in, out)  (== PyTorch W.T)
        "wfc":   jax.random.normal(k3, (NUM_FEATURES, NUM_CLASSES),
                                   jnp.float32) * 0.1,
        "bfc":   jax.random.normal(k4, (NUM_CLASSES,), jnp.float32) * 0.01,
        "wrot":  jax.random.normal(k5, (NUM_FEATURES, NUM_ROT),
                                   jnp.float32) * 0.1,
        "brot":  jax.random.normal(k6, (NUM_ROT,), jnp.float32) * 0.01,
    }


def _im2col_collapsed(x_nchw):
    """(B,C,H,W) -> (9*C, B*H*W) im2col patch matrix.

    K-axis order is (dh, dw, c), matching wconv.reshape(9*C, F); lane axis is
    b*H*W + h*W + w.  Only one tiny (B,C)->(C,B) transpose of the raw input is
    needed (no NHWC transpose, no transpose on the 9x-expanded array).
    """
    b, c, h, w = x_nchw.shape
    x_cbhw = jnp.transpose(x_nchw, (1, 0, 2, 3))               # (C, B, H, W)
    x_pad = jnp.pad(x_cbhw, ((0, 0), (0, 0), (1, 1), (1, 1)))  # zero "same" pad
    taps = [x_pad[:, :, dh:dh + h, dw:dw + w]
            for dh in range(3) for dw in range(3)]             # 9 x (C,B,H,W)
    p = jnp.stack(taps, axis=0)                                # (9, C, B, H, W)
    return p.reshape(9 * c, b * h * w)                         # (9C, B*HW)


def remixmatch_forward(x_nchw, params, use_rot=True):
    """Mirrors ReMixMatch_Net.forward. x_nchw: (B, C, H, W) float32 (NCHW)."""
    b, c, h, w = x_nchw.shape

    # im2col patches, K padded to 48, cast to bf16 for the MXU.
    patches = _im2col_collapsed(x_nchw.astype(jnp.float32))          # (36, B*HW)
    patches = jnp.pad(patches, ((0, K_PAD - 9 * c), (0, 0)))
    patches = patches.astype(jnp.bfloat16)                           # (48, B*HW)

    # Conv weights as one (F, K_PAD) bf16 matrix; tap/channel order matches.
    wconv_mat = params["wconv"].reshape(9 * c, NUM_FEATURES).T       # (F, 36)
    wconv_mat = jnp.pad(wconv_mat, ((0, 0), (0, K_PAD - 9 * c)))
    wconv_mat = wconv_mat.astype(jnp.bfloat16)                       # (F, 48)
    bconv_col = params["bconv"].reshape(NUM_FEATURES, 1).astype(jnp.float32)

    # Fused heads (f32), zero-padded to 128 lanes; fold GAP 1/(H*W) into W only.
    w_heads = jnp.concatenate([params["wfc"], params["wrot"]],
                              axis=1) / float(h * w)                 # (F, 14)
    w_heads = jnp.pad(w_heads, ((0, 0), (0, HEAD_PAD - NUM_HEAD)))   # (F, 128)
    w_heads = w_heads.astype(jnp.float32)
    b_heads = jnp.concatenate([params["bfc"], params["brot"]])
    b_heads = jnp.pad(b_heads, (0, HEAD_PAD - NUM_HEAD))
    b_heads = b_heads.reshape(1, HEAD_PAD).astype(jnp.float32)

    # Single grid step (whole batch); every operand lives fully in VMEM
    # (~120 KiB live, far under every chip's budget).
    vmem = pl.BlockSpec(memory_space=pltpu.MemorySpace.VMEM)
    out = pl.pallas_call(
        remixmatch_kernel,
        out_shape=jax.ShapeDtypeStruct((b, HEAD_PAD), jnp.float32),
        in_specs=[vmem, vmem, vmem, vmem, vmem],
        out_specs=vmem,
    )(patches, wconv_mat, bconv_col, w_heads, b_heads)

    logits = out[:, :NUM_CLASSES]
    if not use_rot:
        # use_rot=False path: backbone(x) -> just the classifier logits.
        # TODO(synk): the rotation head is still computed in-kernel here
        # (wasted but harmless at this size).
        return logits
    logits_rot = out[:, NUM_CLASSES:NUM_HEAD]
    return logits, logits_rot


# Plain-JAX reference (f32 everywhere) for correctness checking.
def reference_forward(x_nchw, params):
    x = jnp.transpose(x_nchw, (0, 2, 3, 1)).astype(jnp.float32)
    conv = jax.lax.conv_general_dilated(
        x, params["wconv"], window_strides=(1, 1), padding="SAME",
        dimension_numbers=("NHWC", "HWIO", "NHWC"))
    conv = jax.nn.relu(conv + params["bconv"])
    feat = jnp.mean(conv, axis=(1, 2))                           # (B, F)
    logits = feat @ params["wfc"] + params["bfc"]
    logits_rot = feat @ params["wrot"] + params["brot"]
    return logits, logits_rot


# --------------------------------- main --------------------------------------
if __name__ == "__main__":
    key = jax.random.PRNGKey(0)
    kx, kp = jax.random.split(key)
    x = jax.random.normal(kx, (B, C_IN, H, W), jnp.float32)      # NCHW like torch
    params = init_params(kp)

    logits, logits_rot = remixmatch_forward(x, params, use_rot=True)
    jax.block_until_ready((logits, logits_rot))

    ref_logits, ref_rot = reference_forward(x, params)
    # bf16 conv operands (f32 accumulation) -> tolerance loosened vs pure-f32.
    np.testing.assert_allclose(np.asarray(logits), np.asarray(ref_logits),
                               rtol=1e-2, atol=1e-2)
    np.testing.assert_allclose(np.asarray(logits_rot), np.asarray(ref_rot),
                               rtol=1e-2, atol=1e-2)

    logits_only = remixmatch_forward(x, params, use_rot=False)
    jax.block_until_ready(logits_only)
    np.testing.assert_allclose(np.asarray(logits_only), np.asarray(ref_logits),
                               rtol=1e-2, atol=1e-2)

    assert logits.shape == (B, NUM_CLASSES)
    assert logits_rot.shape == (B, NUM_ROT)
    print("KERNEL_OK")
</pallas_src>

<mosaic_0001>
module attributes {stable_mosaic.version = 11 : i64} {
  func.func @remixmatch_kernel(%arg0: memref<48x512xbf16, #tpu.memory_space<vmem>>, %arg1: memref<32x48xbf16, #tpu.memory_space<vmem>>, %arg2: memref<32x1xf32, #tpu.memory_space<vmem>>, %arg3: memref<32x128xf32, #tpu.memory_space<vmem>>, %arg4: memref<1x128xf32, #tpu.memory_space<vmem>>, %arg5: memref<2x128xf32, #tpu.memory_space<vmem>>) attributes {dimension_semantics = [], scalar_prefetch = 0 : i64, scratch_operands = 0 : i64, tpu.core_type = #tpu.core_type<tc>} {
    %c0 = arith.constant 0 : index
    %c0_0 = arith.constant 0 : index
    %0 = vector.load %arg1[%c0, %c0_0] : memref<32x48xbf16, #tpu.memory_space<vmem>>, vector<32x48xbf16>
    %c0_1 = arith.constant 0 : index
    %c0_2 = arith.constant 0 : index
    %1 = vector.load %arg0[%c0_1, %c0_2] : memref<48x512xbf16, #tpu.memory_space<vmem>>, vector<48x512xbf16>
    %cst = arith.constant dense<0.000000e+00> : vector<32x512xf32>
    %2 = tpu.matmul %0, %1, %cst {dimension_numbers = #tpu.dot_dimension_numbers<[1], [0], [0], [1], [0, 0, 1, 1], [], []>} : vector<32x48xbf16>, vector<48x512xbf16>, vector<32x512xf32> -> vector<32x512xf32>
    %c0_3 = arith.constant 0 : index
    %c0_4 = arith.constant 0 : index
    %3 = vector.load %arg2[%c0_3, %c0_4] : memref<32x1xf32, #tpu.memory_space<vmem>>, vector<32x1xf32>
    %4 = vector.broadcast %3 : vector<32x1xf32> to vector<32x512xf32>
    %5 = arith.addf %2, %4 : vector<32x512xf32>
    %cst_5 = arith.constant 0.000000e+00 : f32
    %6 = vector.broadcast %cst_5 : f32 to vector<32x512xf32>
    %7 = arith.maximumf %5, %6 : vector<32x512xf32>
    %8 = vector.extract_strided_slice %7 {offsets = [0, 0], sizes = [32, 256], strides = [1, 1]} : vector<32x512xf32> to vector<32x256xf32>
    %cst_6 = arith.constant dense<0.000000e+00> : vector<32xf32>
    %9 = vector.multi_reduction <add>, %8, %cst_6 [1] : vector<32x256xf32> to vector<32xf32>
    %10 = vector.shape_cast %9 : vector<32xf32> to vector<32x1xf32>
    %11 = vector.extract_strided_slice %7 {offsets = [0, 256], sizes = [32, 256], strides = [1, 1]} : vector<32x512xf32> to vector<32x256xf32>
    %cst_7 = arith.constant dense<0.000000e+00> : vector<32xf32>
    %12 = vector.multi_reduction <add>, %11, %cst_7 [1] : vector<32x256xf32> to vector<32xf32>
    %13 = vector.shape_cast %12 : vector<32xf32> to vector<32x1xf32>
    %14 = tpu.concatenate %10, %13 in 1 : vector<32x1xf32>, vector<32x1xf32> -> vector<32x2xf32>
    %c0_8 = arith.constant 0 : index
    %c0_9 = arith.constant 0 : index
    %15 = vector.load %arg3[%c0_8, %c0_9] : memref<32x128xf32, #tpu.memory_space<vmem>>, vector<32x128xf32>
    %cst_10 = arith.constant dense<0.000000e+00> : vector<2x128xf32>
    %16 = tpu.matmul %14, %15, %cst_10 {dimension_numbers = #tpu.dot_dimension_numbers<[0], [0], [1], [1], [0, 1, 1, 1], [], []>} : vector<32x2xf32>, vector<32x128xf32>, vector<2x128xf32> -> vector<2x128xf32>
    %c0_11 = arith.constant 0 : index
    %c0_12 = arith.constant 0 : index
    %17 = vector.load %arg4[%c0_11, %c0_12] : memref<1x128xf32, #tpu.memory_space<vmem>>, vector<1x128xf32>
    %18 = vector.broadcast %17 : vector<1x128xf32> to vector<2x128xf32>
    %19 = arith.addf %16, %18 : vector<2x128xf32>
    %c0_13 = arith.constant 0 : index
    %c0_14 = arith.constant 0 : index
    %20 = vector.load %arg5[%c0_13, %c0_14] : memref<2x128xf32, #tpu.memory_space<vmem>>, vector<2x128xf32>
    tpu.vector_store %arg5[%c0_13, %c0_14], %19 {strides = array<i32>} : memref<2x128xf32, #tpu.memory_space<vmem>>, vector<2x128xf32>,
    return
  }
}

</mosaic_0001>

<bundles_post_ra>
// kernel: tpu_custom_call.1
= control target key start
LH: loop header
LB: loop body
LE: loop exit
PB: predicated region body
PF: predicated region fallthrough
CT: control target
= control target key end

     0   :  { %10 = vsyncpa [#allocation3], 0  ;;  %s703_s0 = inlined_call_operand.hbm [shape: bf16[48,512], index: 0, kind: input, shape index: {}]   ;;  %s704_s1 = inlined_call_operand.hbm [shape: bf16[32,48], index: 1, kind: input, shape index: {}]   ;;  %s705_s2 = inlined_call_operand.vmem [shape: f32[32,1], index: 2, kind: input, shape index: {}]   ;;  %s706_s3 = inlined_call_operand.vmem [shape: f32[32,128], index: 3, kind: input, shape index: {}]   ;;  %s707_s4 = inlined_call_operand.vmem [shape: f32[1,128], index: 4, kind: input, shape index: {}]   ;;  %s708_s5 = inlined_call_operand.hbm [shape: f32[2,128], index: 5, kind: output, shape index: {}]  }
   0x1   :  { %11 = vsyncpa [#allocation6], 0 }
   0x2   :  { %12 = vsyncpa [#allocation4], 0  ;;  %s599_s18 = smov [#allocation2]   ;;  %s527_s22 = scalar_lea.hbm %s703_s0, 1536 }
   0x3   :  { %s18_s19 = sshll.u32 %s599_s18, 4  ;;  %p528_p0 = scmp.ne.s32.totalorder %s703_s0, %s527_s22  ;;  %s19_s19 = int_to_ptr.vmem [resolvable:$true] %s18_s19 }
   0x4   :  { %p531_p1 = scmp.lt.u32.totalorder %s527_s22, %s703_s0 }
   0x6   :  { %p533_p2 = pnand %p531_p1, %p528_p0 }
   0x8   :  { %536 = shalt.err (!%p533_p2)
}
   0x9   :  { %s537_s27 = scalar_lea.vmem %s19_s19, 1536  ;;  %p542_p4 = scmp.lt.s32.totalorder %s19_s19, %s19_s19 }
   0xa   :  { %p538_p3 = scmp.ne.s32.totalorder %s19_s19, %s537_s27  ;;  %p543_p5 = scmp.lt.s32.totalorder %s537_s27, %s537_s27 }
   0xc   :  { %p544_p6 = por %p543_p5, %p542_p4 }
   0xe   :  { %p545_p7 = pnand %p544_p6, %p538_p3 }
  0x10   :  { %548 = shalt.err (!%p545_p7)
}
  0x11   :  { %s600_s28 = smov 256   ;;  %s601_s29 = smov 16  }
  0x12   :  { %24 = dma.hbm_to_vmem [thread:$0]  %s703_s0, 1536, %s19_s19, [#allocation3], %s600_s28, %s600_s28, %s601_s29  }
  0x13   :  { %s602_s7 = smov [#allocation5]   ;;  %s549_s11 = scalar_lea.hbm %s704_s1, 256 }
  0x14   :  { %s30_s8 = sshll.u32 %s602_s7, 4  ;;  %p550_p8 = scmp.ne.s32.totalorder %s704_s1, %s549_s11  ;;  %s31_s8 = int_to_ptr.vmem [resolvable:$true] %s30_s8 }
  0x15   :  { %p553_p9 = scmp.lt.u32.totalorder %s549_s11, %s704_s1 }
  0x17   :  { %p555_p10 = pnand %p553_p9, %p550_p8 }
  0x19   :  { %558 = shalt.err (!%p555_p10)
}
  0x1a   :  { %s559_s16 = scalar_lea.vmem %s31_s8, 256  ;;  %p564_p12 = scmp.lt.s32.totalorder %s31_s8, %s31_s8 }
  0x1b   :  { %p560_p11 = scmp.ne.s32.totalorder %s31_s8, %s559_s16  ;;  %p565_p13 = scmp.lt.s32.totalorder %s559_s16, %s559_s16 }
  0x1d   :  { %p566_p0 = por %p565_p13, %p564_p12 }
  0x1f   :  { %p567_p1 = pnand %p566_p0, %p560_p11 }
  0x21   :  { %570 = shalt.err (!%p567_p1)
}
  0x22   :  { %s603_s0 = smov 64   ;;  %s604_s17 = smov 4  }
  0x23   :  { %36 = dma.hbm_to_vmem [thread:$0]  %s704_s1, 256, %s31_s8, [#allocation6], %s603_s0, %s603_s0, %s604_s17  }
  0x24   :  { %593 = dma.done.wait [#allocation3], 1536  }
  0x25   :  { %594 = vsyncadd [#allocation3], 4294965760 }
  0x26   :  { %595 = dma.done.wait [#allocation6], 256  }
  0x27   :  { %596 = vsyncadd [#allocation6], 4294967040  ;;  %v605_v0 = vmov 0   ;;  %v507_v1 = vld [vmem:[#allocation2 + $0x4] ss:$16 sps:$4 sm:$0xff]   ;;  %vm160_vm0 = vcmask 392192  }
  0x28   :  { %199 = vmatprep.mubr.bf16.mxu0 %v605_v0  ;;  %252 = vmatprep.mubr.bf16.mxu1 %v605_v0  ;;  %v509_v2 = vld [vmem:[#allocation2 + $0xc] ss:$16 sps:$4 sm:$0xff]   ;;  %v511_v3 = vld [vmem:[#allocation2] ss:$16 sps:$4 sm:$0xff]   ;;  %v512_v4 = vld [vmem:[#allocation2 + $0x8] ss:$16 sps:$4 sm:$0xff]  }
  0x29   :  { %505 = vset.pattern.permute.xlu0 %v605_v0  ;;  %506 = vset.pattern.permute.xlu1 %v605_v0  ;;  %v513_v5 = vld [vmem:[#allocation2 + $0x24] ss:$16 sps:$4 sm:$0xff]   ;;  %v515_v6 = vld [vmem:[#allocation2 + $0x2c] ss:$16 sps:$4 sm:$0xff]   ;;  %v517_v7 = vld [vmem:[#allocation2 + $0x20] ss:$16 sps:$4 sm:$0xff]  }
  0x2a   :  { %167 = vmatprep.subr.bf16.mxu0 %v507_v1  ;;  %220 = vmatprep.subr.bf16.mxu1 %v509_v2  ;;  %v518_v8 = vld [vmem:[#allocation2 + $0x28] ss:$16 sps:$4 sm:$0xff]   ;;  %v519_v9 = vld [vmem:[#allocation2 + $0x44] ss:$16 sps:$4 sm:$0xff]   ;;  %v521_v10 = vld [vmem:[#allocation2 + $0x4c] ss:$16 sps:$4 sm:$0xff]  }
  0x2b   :  { %168 = vmatpush1.bf16.msra.mxu0 %v511_v3  ;;  %221 = vmatpush1.bf16.msra.mxu1 %v512_v4  ;;  %v523_v11 = vld [vmem:[#allocation2 + $0x40] ss:$16 sps:$4 sm:$0xff]   ;;  %v524_v12 = vld [vmem:[#allocation2 + $0x48] ss:$16 sps:$4 sm:$0xff]   ;;  %vm607_vm1 = vmmov 0   ;;  %vm313_vm2 = vcmask 7168  }
  0x2c   :  { %169 = vmatprep.subr.bf16.mxu0 %v513_v5  ;;  %222 = vmatprep.subr.bf16.mxu1 %v515_v6  ;;  %v66_v13 = vld [vmem:[%s705_s2] sm:$0xff]  ;;  %v68_v14 = vld [vmem:[%s705_s2 + $0x10] sm:$0xff]  ;;  %v67_v16 = vld [vmem:[%s705_s2 + $0x8] sm:$0xff]  ;;  %vm361_vm3 = vcmask 261120   ;;  %s609_s10 = smov [#allocation7]  }
  0x2d   :  { %v525_v15 = vld [vmem:[#allocation5] sm:$0xff]   ;;  %72 = vperm.xlu0 %505, %v66_v13   ;;  %82 = vperm.xlu1 %506, %v68_v14   ;;  %v69_v17 = vld [vmem:[%s705_s2 + $0x18] sm:$0xff]  ;;  %v526_v18 = vld [vmem:[#allocation5 + $0x8] sm:$0xff]   ;;  %s442_s11 = sshll.u32 %s609_s10, 4  ;;  %s443_s11 = int_to_ptr.vmem [resolvable:$true] %s442_s11 }
  0x2e   :  { %s571_s12 = scalar_lea.vmem %s443_s11, 32  ;;  %p576_p3 = scmp.lt.s32.totalorder %s443_s11, %s443_s11 }
  0x2f   :  { %170 = vmatpush1.bf16.msra.mxu0 %v517_v7  ;;  %223 = vmatpush1.bf16.msra.mxu1 %v518_v8  ;;  %p572_p2 = scmp.ne.s32.totalorder %s443_s11, %s571_s12  ;;  %p577_p4 = scmp.lt.s32.totalorder %s571_s12, %s571_s12 }
  0x30   :  { %171 = vmatprep.subr.bf16.mxu0 %v519_v9  ;;  %224 = vmatprep.subr.bf16.mxu1 %v521_v10 }
  0x31   :  { %77 = vperm.xlu0 %505, %v67_v16   ;;  %87 = vperm.xlu1 %506, %v69_v17   ;;  %v319_v16 = vld [vmem:[%s706_s3 + $0x8] sm:$0xff]  ;;  %v320_v17 = vld [vmem:[%s706_s3 + $0x10] sm:$0xff]  ;;  %p578_p5 = por %p577_p4, %p576_p3 }
  0x33   :  { %172 = vmatpush1.bf16.msra.mxu0 %v523_v11  ;;  %225 = vmatpush1.bf16.msra.mxu1 %v524_v12  ;;  %p579_p6 = pnand %p578_p5, %p572_p2 }
  0x36   :  { %466 = vmatmul.mubr.msk.bf16.vlgmr.msra.gmra.mrb[0].mxu0 %vm160_vm0, %v525_v15  ;;  %468 = vmatmul.mubr.msk.bf16.vlgmr.msra.gmra.mrb[0].mxu1 %vm160_vm0, %v525_v15  ;;  %v318_v15 = vld [vmem:[%s706_s3] sm:$0xff] }
  0x37   :  { %209 = vmatprep.mubr.bf16.mxu0 %v605_v0  ;;  %262 = vmatprep.mubr.bf16.mxu1 %v605_v0 }
  0x3e   :  { %467 = vmatmul.mubr.msk.bf16.gmra.mrb[4].mxu0 %vm160_vm0, %v526_v18  ;;  %469 = vmatmul.mubr.msk.bf16.gmra.mrb[4].mxu1 %vm160_vm0, %v526_v18  ;;  %v606_v18 = vmov 0.0|0.0  }
  0x3f   :  { %488 = vmatprep.subr.bf16.mxu0 %v606_v18 }
  0xac   :  { %v73_v19 = vpop.permute.xlu0 %72  ;;  %v83_v21 = vpop.permute.xlu1 %82 }
  0xb0   :  { %v78_v20 = vpop.permute.xlu0 %77  ;;  %v88_v48 = vpop.permute.xlu1 %87 }
 0x109   :  { %v201_v22 = vpop.f32.mrb[0].mxu0  ;;  %v254_v23 = vpop.f32.mrb[0].mxu1 }
 0x10a   :  { %v202_v24 = vadd.f32 %v201_v22, %v73_v19  ;;  %v255_v25 = vadd.f32 %v254_v23, %v73_v19  ;;  %v203_v26 = vpop.f32.mrb[1].mxu0  ;;  %v256_v27 = vpop.f32.mrb[1].mxu1 }
 0x10b   :  { %v204_v28 = vadd.f32 %v203_v26, %v73_v19  ;;  %v257_v29 = vadd.f32 %v256_v27, %v73_v19  ;;  %v205_v30 = vpop.f32.mrb[2].mxu0  ;;  %v258_v31 = vpop.f32.mrb[2].mxu1  ;;  %v489_v19 = vpack.c.bf16 %v319_v16, %v318_v15 }
 0x10c   :  { %v273_v32 = vmax.f32 %v202_v24, 0.0  ;;  %v275_v33 = vmax.f32 %v255_v25, 0.0  ;;  %v206_v34 = vadd.f32 %v205_v30, %v78_v20  ;;  %v259_v35 = vadd.f32 %v258_v31, %v78_v20  ;;  %v207_v36 = vpop.f32.mrb[3].mxu0  ;;  %v260_v37 = vpop.f32.mrb[3].mxu1 }
 0x10d   :  { %v274_v38 = vmax.f32 %v204_v28, 0.0  ;;  %v276_v39 = vmax.f32 %v257_v29, 0.0  ;;  %v208_v40 = vadd.f32 %v207_v36, %v78_v20  ;;  %v261_v41 = vadd.f32 %v260_v37, %v78_v20  ;;  %v321_v20 = vld [vmem:[%s706_s3 + $0x18] sm:$0xff]  ;;  %490 = vmatpush3.bf16.msra.mxu0 %v489_v19  ;;  %v470_v36 = vld [vmem:[%s707_s4] ss:$0 sm:$0xff] }
 0x10e   :  { %v277_v42 = vmax.f32 %v206_v34, 0.0  ;;  %v279_v43 = vmax.f32 %v259_v35, 0.0  ;;  %v492_v22 = vpack.c.bf16 %v321_v20, %v320_v17  ;;  %491 = vmatprep.subr.bf16.mxu0 %v606_v18 }
 0x10f   :  { %v278_v44 = vmax.f32 %v208_v40, 0.0  ;;  %v280_v45 = vmax.f32 %v261_v41, 0.0  ;;  %v301_v46 = vadd.f32 %v276_v39, %v275_v33  ;;  %v289_v47 = vadd.f32 %v274_v38, %v273_v32 }
 0x111   :  { %302 = vadd.xlane.f32.xlu1 %v301_v46  ;;  %v211_v49 = vpop.f32.mrb[4].mxu0  ;;  %290 = vadd.xlane.f32.xlu0 %v289_v47  ;;  %v264_v50 = vpop.f32.mrb[4].mxu1  ;;  %v292_v51 = vadd.f32 %v278_v44, %v277_v42  ;;  %v304_v52 = vadd.f32 %v280_v45, %v279_v43 }
 0x112   :  { %v212_v53 = vadd.f32 %v211_v49, %v83_v21  ;;  %v213_v54 = vpop.f32.mrb[5].mxu0  ;;  %v265_v55 = vadd.f32 %v264_v50, %v83_v21  ;;  %v266_v56 = vpop.f32.mrb[5].mxu1  ;;  %493 = vmatpush3.bf16.msra.mxu0 %v492_v22 }
 0x113   :  { %v214_v57 = vadd.f32 %v213_v54, %v83_v21  ;;  %v267_v58 = vadd.f32 %v266_v56, %v83_v21  ;;  %v215_v59 = vpop.f32.mrb[6].mxu0  ;;  %v268_v60 = vpop.f32.mrb[6].mxu1  ;;  %v608_v21 = vmov 0.0  }
 0x114   :  { %v281_v61 = vmax.f32 %v212_v53, 0.0  ;;  %v283_v62 = vmax.f32 %v265_v55, 0.0  ;;  %v217_v63 = vpop.f32.mrb[7].mxu0  ;;  %v270_v0 = vpop.f32.mrb[7].mxu1  ;;  %v216_v1 = vadd.f32 %v215_v59, %v88_v48  ;;  %v269_v2 = vadd.f32 %v268_v60, %v88_v48  ;;  %485 = vmatprep.mubr.msk.f32.mxu0 %vm607_vm1, %v608_v21 }
 0x115   :  { %v282_v3 = vmax.f32 %v214_v57, 0.0  ;;  %v284_v4 = vmax.f32 %v267_v58, 0.0  ;;  %v218_v5 = vadd.f32 %v217_v63, %v88_v48  ;;  %v271_v6 = vadd.f32 %v270_v0, %v88_v48  ;;  %293 = vadd.xlane.f32.xlu0 %v292_v51 }
 0x116   :  { %v285_v7 = vmax.f32 %v216_v1, 0.0  ;;  %v287_v8 = vmax.f32 %v269_v2, 0.0 }
 0x117   :  { %v286_v9 = vmax.f32 %v218_v5, 0.0  ;;  %v288_v10 = vmax.f32 %v271_v6, 0.0  ;;  %v295_v11 = vadd.f32 %v282_v3, %v281_v61  ;;  %v307_v12 = vadd.f32 %v284_v4, %v283_v62 }
 0x119   :  { %296 = vadd.xlane.f32.xlu1 %v295_v11  ;;  %305 = vadd.xlane.f32.xlu0 %v304_v52  ;;  %v298_v13 = vadd.f32 %v286_v9, %v285_v7  ;;  %v310_v14 = vadd.f32 %v288_v10, %v287_v8 }
 0x11d   :  { %299 = vadd.xlane.f32.xlu1 %v298_v13  ;;  %308 = vadd.xlane.f32.xlu0 %v307_v12 }
 0x121   :  { %311 = vadd.xlane.f32.xlu0 %v310_v14 }
 0x19e   :  { %v303_v23 = vpop.xlane.xlu1 %302  ;;  %v291_v24 = vpop.xlane.xlu0 %290 }
 0x19f   :  { %v314_v25 = vsel %vm313_vm2, %v291_v24, %v303_v23 }
 0x1a0   :  { %329 = vxpose.xlu1.b32.start [1/4] (short) (narrow) %v314_v25, 8 }
 0x1a2   :  { %v294_v26 = vpop.xlane.xlu0 %293 }
 0x1a6   :  { %v306_v27 = vpop.xlane.xlu0 %305  ;;  %v297_v29 = vpop.xlane.xlu1 %296 }
 0x1a7   :  { %v315_v28 = vsel %vm313_vm2, %v294_v26, %v306_v27 }
 0x1a8   :  { %330 = vxpose.xlu1.b32.cont [2/4] (short) (narrow) %v315_v28, 8 }
 0x1aa   :  { %v309_v30 = vpop.xlane.xlu0 %308  ;;  %v300_v32 = vpop.xlane.xlu1 %299 }
 0x1ab   :  { %v316_v31 = vsel %vm313_vm2, %v297_v29, %v309_v30 }
 0x1ac   :  { %331 = vxpose.xlu1.b32.cont [3/4] (short) (narrow) %v316_v31, 8 }
 0x1ae   :  { %v312_v33 = vpop.xlane.xlu0 %311 }
 0x1af   :  { %v317_v34 = vsel %vm313_vm2, %v300_v32, %v312_v33 }
 0x1b0   :  { %332 = vxpose.xlu1.b32.end [4/4] (short) (narrow) %v317_v34, 8 }
 0x224   :  { %v345_v35 = vpop.trf.xlu1 }
 0x225   :  { %486 = vmatmul.mubr.msk.f32.vlgmr.msra.gmra.mrb[8].mxu0 %vm361_vm3, %v345_v35 }
 0x2f8   :  { %v431_v37 = vpop.f32.mrb[8].mxu0 }
 0x2f9   :  { %v432_v38 = vadd.f32 %v470_v36, %v431_v37  ;;  %v487_v39 = vpop.f32.mrb[9].mxu0 }
 0x2fb   :  { %435 = vst [vmem:[#allocation7] sm:$0x3] %v432_v38 }
 0x2fc   :  { %582 = shalt.err (!%p579_p6)
}
 0x2fd   :  { %s583_s15 = scalar_lea.hbm %s708_s5, 32 }
 0x2fe   :  { %p584_p7 = scmp.ne.s32.totalorder %s708_s5, %s583_s15  ;;  %p587_p8 = scmp.lt.u32.totalorder %s583_s15, %s708_s5 }
 0x300   :  { %p589_p9 = pnand %p587_p8, %p584_p7 }
 0x302   :  { %592 = shalt.err (!%p589_p9)
}
 0x303   :  { %445 = dma.vmem_to_hbm [thread:$0]  %s443_s11, 32, %s708_s5, [#allocation4]  }
 0x304   :  { %597 = dma.done.wait [#allocation4], 32  }
 0x305   :  { %598 = vsyncadd [#allocation4], 4294967264 }
 0x306   :  { %449 = vsyncpa [#allocation3], 1 }
 0x307   :  { %450 = vsyncpa [#allocation6], 1 }
 0x308   :  { %451 = vsyncpa [#allocation4], 1 }

</bundles_post_ra>
